<compile_context>
chip_gen: v5e
topology: v5e:2x2
jax: 0.10.0
libtpu: 0.0.40
codegen_flags: <defaults>
</compile_context>

<pallas_src>
import functools
import math

import jax
import jax.numpy as jnp
import numpy as np
from jax.experimental import pallas as pl
from jax.experimental.pallas import tpu as pltpu

# ----------------------------- config ---------------------------------------
B = 2          # batch
T = 8          # sequence length (tokens)
D = 32         # token embedding dim
H = 4          # heads
DH = D // H    # dim_head = dim / heads (default)
F = 64         # dim_linear_block (kept small for the example)
EPS = 1e-5     # nn.LayerNorm default eps


# ----------------------------- kernel helpers --------------------------------
def _layernorm(x, w, b):
    mu = jnp.mean(x, axis=-1, keepdims=True)
    xc = x - mu
    var = jnp.mean(xc * xc, axis=-1, keepdims=True)
    inv = jax.lax.rsqrt(var + EPS)
    return xc * inv * w + b


def _gelu_exact(x):
    # PyTorch nn.GELU default (approximate='none')
    return 0.5 * x * (1.0 + jax.lax.erf(x * (1.0 / math.sqrt(2.0))))


# ----------------------------- kernel ----------------------------------------
def transformer_block_kernel(
    x_ref,        # (TT, D)   TT = tokens per tile (whole sequences only)
    bias_ref,     # (TT, TT)  additive attention bias (block-diag 0 / -1e30)
    wa_ref,       # (D, 3*H*DH + D) = [Wq*scale | Wk | Wv | W0^T], lane-dense
    wb_ref,       # (max(D,F), 128) = [W1^T at [:D,:F] | W2^T at [:F,F:F+D]]
    vec_ref,      # (8, 128): rows = ln1w, ln1b, ln2w, ln2b, b1, b2, 0, 0
    o_ref,        # (TT, D)
    *, dim, heads, dim_head, dim_ff,
):
    hd = heads * dim_head

    x = x_ref[...]                         # (TT, D)
    bias = bias_ref[...]                   # (TT, TT)
    wa = wa_ref[...]                       # (D, 3*HD + D)
    vec = vec_ref[...]                     # (8, 128)

    ln1w, ln1b = vec[0:1, :dim], vec[1:2, :dim]
    ln2w, ln2b = vec[2:3, :dim], vec[3:4, :dim]
    b1 = vec[4:5, :dim_ff]
    b2 = vec[5:6, :dim]

    # ---- fused QKV projection (attention scale pre-folded into Q columns) ----
    qkv = jnp.dot(x, wa[:, :3 * hd], preferred_element_type=jnp.float32)
    q = qkv[:, 0:hd]
    k = qkv[:, hd:2 * hd]
    v = qkv[:, 2 * hd:3 * hd]
    w0t = wa[:, 3 * hd:3 * hd + dim]        # (HD, D) == W_0^T  (HD == D here)

    # ---- issue every per-head score matmul before consuming any result ----
    scores = []
    for h in range(heads):                  # static unroll (H = 4)
        sl = slice(h * dim_head, (h + 1) * dim_head)
        s = jax.lax.dot_general(q[:, sl], k[:, sl], (((1,), (1,)), ((), ())),
                                preferred_element_type=jnp.float32)  # (TT, TT)
        scores.append(s + bias)

    # ---- per-head softmax + PV + fused W0 accumulation (register-resident) ----
    attn_out = jnp.zeros((x.shape[0], dim), jnp.float32)
    for h in range(heads):
        sl = slice(h * dim_head, (h + 1) * dim_head)
        s = scores[h]
        s = s - jnp.max(s, axis=-1, keepdims=True)
        p = jnp.exp(s)
        p = p * pl.reciprocal(jnp.sum(p, axis=-1, keepdims=True), approx=False)
        pv = jnp.dot(p, v[:, sl], preferred_element_type=jnp.float32)   # (TT, DH)
        attn_out = attn_out + jnp.dot(pv, w0t[sl, :],
                                      preferred_element_type=jnp.float32)

    # dropout is identity at inference time (eval-mode semantics)
    y = _layernorm(attn_out + x, ln1w, ln1b)                  # (TT, D)

    # ---- feed-forward ----
    wb = wb_ref[...]
    w1 = wb[:dim, :dim_ff]                                    # (D, F)
    w2 = wb[:dim_ff, dim_ff:dim_ff + dim]                     # (F, D)
    h1 = _gelu_exact(jnp.dot(y, w1, preferred_element_type=jnp.float32) + b1)
    ff = jnp.dot(h1, w2, preferred_element_type=jnp.float32) + b2

    o_ref[...] = _layernorm(ff + y, ln2w, ln2b)               # (TT, D)


# ----------------------------- wrapper ----------------------------------------
def _seqs_per_tile(batch, seq, target_tokens=512):
    """Whole-sequence tile size: aim for ~target_tokens per grid step, but keep
    >=2 grid steps when batch allows so v7x's two TensorCores both get work."""
    spt = max(1, min(batch, max(1, target_tokens // max(seq, 1))))
    while spt > 1 and batch // spt < 2:
        spt -= 1
    while batch % spt != 0:
        spt -= 1
    return spt


def transformer_block(x, params):
    wa, wb, vecs = params
    bx, tx, dx = x.shape
    bt = bx * tx
    x2 = x.reshape(bt, dx)

    spt = _seqs_per_tile(bx, tx)
    tile_tokens = spt * tx
    num_tiles = bx // spt
    assert num_tiles * tile_tokens == bt
    assert tile_tokens % 8 == 0 or num_tiles == 1, "token tile must be sublane-aligned"

    # Additive block-diagonal attention bias: a token attends only within its
    # own sequence.  Identical for every tile -> constant index_map, one DMA.
    row_seq = jnp.arange(tile_tokens, dtype=jnp.int32) // tx
    bias = jnp.where(row_seq[:, None] == row_seq[None, :],
                     jnp.float32(0.0), jnp.float32(-1e30))

    kernel = functools.partial(
        transformer_block_kernel, dim=dx, heads=H, dim_head=DH, dim_ff=F)

    out_flat = pl.pallas_call(
        kernel,
        out_shape=jax.ShapeDtypeStruct((bt, dx), jnp.float32),
        grid_spec=pltpu.PrefetchScalarGridSpec(
            num_scalar_prefetch=0,
            grid=(num_tiles,),                                   # token-tile axis
            in_specs=[
                pl.BlockSpec((tile_tokens, dx), lambda i: (i, 0)),   # x tile
                pl.BlockSpec(bias.shape, lambda i: (0, 0)),          # attn bias (const)
                pl.BlockSpec(wa.shape, lambda i: (0, 0)),            # fused QKV + W0
                pl.BlockSpec(wb.shape, lambda i: (0, 0)),            # fused W1 + W2
                pl.BlockSpec(vecs.shape, lambda i: (0, 0)),          # packed vectors
            ],
            out_specs=pl.BlockSpec((tile_tokens, dx), lambda i: (i, 0)),
        ),
        compiler_params=pltpu.CompilerParams(
            dimension_semantics=("parallel",),          # shard tiles across TCs (v7x)
            vmem_limit_bytes=32 * 1024 * 1024),         # explicit, < v7x's 64 MiB
    )(x2, bias, wa, wb, vecs)

    return out_flat.reshape(bx, tx, dx)


# ------------------------- parameter construction ----------------------------
def make_params(key):
    ks = jax.random.split(key, 6)
    # PyTorch-layout weights (out_features, in_features)
    w_qkv = jax.random.normal(ks[0], (3 * H * DH, D), jnp.float32) * 0.05
    w_0 = jax.random.normal(ks[1], (D, H * DH), jnp.float32) * 0.05
    w_1 = jax.random.normal(ks[2], (F, D), jnp.float32) * 0.05
    b_1 = jax.random.normal(ks[3], (F,), jnp.float32) * 0.05
    w_2 = jax.random.normal(ks[4], (D, F), jnp.float32) * 0.05
    b_2 = jax.random.normal(ks[5], (D,), jnp.float32) * 0.05
    ln1w = jnp.ones((D,), jnp.float32)
    ln1b = jnp.zeros((D,), jnp.float32)
    ln2w = jnp.ones((D,), jnp.float32)
    ln2b = jnp.zeros((D,), jnp.float32)

    # Split W_qkv according to einops 'b t (d k h) -> k b h t d' with k=3, h=H:
    # flat row index = d*3*H + kk*H + h.  Build head-major (D, H*DH) mats so
    # the kernel's column h*DH + d equals q[b, h, t, d] of the reference.
    w_qkv_r = w_qkv.reshape(DH, 3, H, D)                 # [d, kk, h, c]

    def head_major(kk):
        return jnp.transpose(w_qkv_r[:, kk, :, :], (2, 1, 0)).reshape(D, H * DH)

    scale = DH ** (-0.5)
    wq = head_major(0) * scale            # fold attention scale into Wq
    wk = head_major(1)
    wv = head_major(2)

    hd = H * DH
    assert hd == D, "packing W0 into the QKV slab assumes heads*dim_head == dim"
    assert 3 * hd + D == 128
    wa = jnp.concatenate([wq, wk, wv, w_0.T], axis=1)    # (D, 128) lane-dense

    wb = jnp.zeros((max(D, F), 128), jnp.float32)        # (64, 128) lane-dense
    wb = wb.at[:D, :F].set(w_1.T)                        # W1^T  (D, F)
    wb = wb.at[:F, F:F + D].set(w_2.T)                   # W2^T  (F, D)

    vecs = jnp.zeros((8, 128), jnp.float32)
    vecs = vecs.at[0, :D].set(ln1w)
    vecs = vecs.at[1, :D].set(ln1b)
    vecs = vecs.at[2, :D].set(ln2w)
    vecs = vecs.at[3, :D].set(ln2b)
    vecs = vecs.at[4, :F].set(b_1)
    vecs = vecs.at[5, :D].set(b_2)

    kernel_params = (wa, wb, vecs)
    torch_params = (w_qkv, w_0, w_1, b_1, w_2, b_2, ln1w, ln1b, ln2w, ln2b)
    return kernel_params, torch_params


# ------------------------- pure-JAX reference --------------------------------
def reference(x, torch_params):
    w_qkv, w_0, w_1, b_1, w_2, b_2, ln1w, ln1b, ln2w, ln2b = torch_params

    def ln(v, w, b):
        mu = jnp.mean(v, axis=-1, keepdims=True)
        var = jnp.mean((v - mu) ** 2, axis=-1, keepdims=True)
        return (v - mu) / jnp.sqrt(var + EPS) * w + b

    qkv = x @ w_qkv.T                                        # (B, T, 3*H*DH)
    r = qkv.reshape(B, T, DH, 3, H)                          # (b t d k h)
    q = jnp.transpose(r[:, :, :, 0, :], (0, 3, 1, 2))        # (b h t d)
    k = jnp.transpose(r[:, :, :, 1, :], (0, 3, 1, 2))
    v = jnp.transpose(r[:, :, :, 2, :], (0, 3, 1, 2))
    s = jnp.einsum("bhid,bhjd->bhij", q, k) * (DH ** -0.5)
    a = jax.nn.softmax(s, axis=-1)
    o = jnp.einsum("bhij,bhjd->bhid", a, v)                  # (b h t d)
    o = jnp.transpose(o, (0, 2, 1, 3)).reshape(B, T, H * DH) # b t (h d)
    attn = o @ w_0.T
    y = ln(attn + x, ln1w, ln1b)
    hmid = jax.nn.gelu(y @ w_1.T + b_1, approximate=False)
    ff = hmid @ w_2.T + b_2
    return ln(ff + y, ln2w, ln2b)


# ----------------------------- main ------------------------------------------
if __name__ == "__main__":
    key = jax.random.PRNGKey(0)
    kx, kp = jax.random.split(key)
    x = jax.random.normal(kx, (B, T, D), jnp.float32)
    kernel_params, torch_params = make_params(kp)

    out = transformer_block(x, kernel_params)
    out = jax.block_until_ready(out)

    ref = reference(x, torch_params)
    np.testing.assert_allclose(np.asarray(out), np.asarray(ref),
                               rtol=1e-5, atol=1e-5)
    print("KERNEL_OK")
</pallas_src>

<mosaic_0001>
module attributes {stable_mosaic.version = 11 : i64} {
  func.func @transformer_block_kernel(%arg0: i32, %arg1: memref<8x32xf32, #tpu.memory_space<vmem>>, %arg2: memref<8x8xf32, #tpu.memory_space<vmem>>, %arg3: memref<32x128xf32, #tpu.memory_space<vmem>>, %arg4: memref<64x128xf32, #tpu.memory_space<vmem>>, %arg5: memref<8x128xf32, #tpu.memory_space<vmem>>, %arg6: memref<8x32xf32, #tpu.memory_space<vmem>>) attributes {dimension_semantics = [#tpu.dimension_semantics<parallel>], iteration_bounds = array<i64: 2>, scalar_prefetch = 0 : i64, scratch_operands = 0 : i64, tpu.core_type = #tpu.core_type<tc>, window_params = [{transform_indices = @transform_0, window_bounds = array<i64: 8, 32>}, {pipeline_mode = #tpu.pipeline_mode<synchronous>, transform_indices = @transform_1, window_bounds = array<i64: 8, 8>}, {pipeline_mode = #tpu.pipeline_mode<synchronous>, transform_indices = @transform_2, window_bounds = array<i64: 32, 128>}, {pipeline_mode = #tpu.pipeline_mode<synchronous>, transform_indices = @transform_3, window_bounds = array<i64: 64, 128>}, {pipeline_mode = #tpu.pipeline_mode<synchronous>, transform_indices = @transform_4, window_bounds = array<i64: 8, 128>}, {transform_indices = @transform_5, window_bounds = array<i64: 8, 32>}]} {
    %c0 = arith.constant 0 : index
    %c0_0 = arith.constant 0 : index
    %0 = vector.load %arg1[%c0, %c0_0] : memref<8x32xf32, #tpu.memory_space<vmem>>, vector<8x32xf32>
    %c0_1 = arith.constant 0 : index
    %c0_2 = arith.constant 0 : index
    %1 = vector.load %arg2[%c0_1, %c0_2] : memref<8x8xf32, #tpu.memory_space<vmem>>, vector<8x8xf32>
    %c0_3 = arith.constant 0 : index
    %c0_4 = arith.constant 0 : index
    %2 = vector.load %arg3[%c0_3, %c0_4] : memref<32x128xf32, #tpu.memory_space<vmem>>, vector<32x128xf32>
    %c0_5 = arith.constant 0 : index
    %c0_6 = arith.constant 0 : index
    %3 = vector.load %arg5[%c0_5, %c0_6] : memref<8x128xf32, #tpu.memory_space<vmem>>, vector<8x128xf32>
    %4 = vector.extract_strided_slice %3 {offsets = [0, 0], sizes = [1, 32], strides = [1, 1]} : vector<8x128xf32> to vector<1x32xf32>
    %5 = vector.extract_strided_slice %3 {offsets = [1, 0], sizes = [1, 32], strides = [1, 1]} : vector<8x128xf32> to vector<1x32xf32>
    %6 = vector.extract_strided_slice %3 {offsets = [2, 0], sizes = [1, 32], strides = [1, 1]} : vector<8x128xf32> to vector<1x32xf32>
    %7 = vector.extract_strided_slice %3 {offsets = [3, 0], sizes = [1, 32], strides = [1, 1]} : vector<8x128xf32> to vector<1x32xf32>
    %8 = vector.extract_strided_slice %3 {offsets = [4, 0], sizes = [1, 64], strides = [1, 1]} : vector<8x128xf32> to vector<1x64xf32>
    %9 = vector.extract_strided_slice %3 {offsets = [5, 0], sizes = [1, 32], strides = [1, 1]} : vector<8x128xf32> to vector<1x32xf32>
    %10 = vector.extract_strided_slice %2 {offsets = [0, 0], sizes = [32, 96], strides = [1, 1]} : vector<32x128xf32> to vector<32x96xf32>
    %cst = arith.constant dense<0.000000e+00> : vector<8x96xf32>
    %11 = tpu.matmul %0, %10, %cst {dimension_numbers = #tpu.dot_dimension_numbers<[1], [0], [0], [1], [0, 0, 1, 1], [], []>} : vector<8x32xf32>, vector<32x96xf32>, vector<8x96xf32> -> vector<8x96xf32>
    %12 = vector.extract_strided_slice %11 {offsets = [0, 0], sizes = [8, 32], strides = [1, 1]} : vector<8x96xf32> to vector<8x32xf32>
    %13 = vector.extract_strided_slice %11 {offsets = [0, 32], sizes = [8, 32], strides = [1, 1]} : vector<8x96xf32> to vector<8x32xf32>
    %14 = vector.extract_strided_slice %11 {offsets = [0, 64], sizes = [8, 32], strides = [1, 1]} : vector<8x96xf32> to vector<8x32xf32>
    %15 = vector.extract_strided_slice %2 {offsets = [0, 96], sizes = [32, 32], strides = [1, 1]} : vector<32x128xf32> to vector<32x32xf32>
    %16 = vector.extract_strided_slice %12 {offsets = [0, 0], sizes = [8, 8], strides = [1, 1]} : vector<8x32xf32> to vector<8x8xf32>
    %17 = vector.extract_strided_slice %13 {offsets = [0, 0], sizes = [8, 8], strides = [1, 1]} : vector<8x32xf32> to vector<8x8xf32>
    %cst_7 = arith.constant dense<0.000000e+00> : vector<8x8xf32>
    %18 = tpu.matmul %16, %17, %cst_7 {dimension_numbers = #tpu.dot_dimension_numbers<[1], [1], [0], [0], [0, 0, 1, 0], [], []>} : vector<8x8xf32>, vector<8x8xf32>, vector<8x8xf32> -> vector<8x8xf32>
    %19 = arith.addf %18, %1 : vector<8x8xf32>
    %20 = vector.extract_strided_slice %12 {offsets = [0, 8], sizes = [8, 8], strides = [1, 1]} : vector<8x32xf32> to vector<8x8xf32>
    %21 = vector.extract_strided_slice %13 {offsets = [0, 8], sizes = [8, 8], strides = [1, 1]} : vector<8x32xf32> to vector<8x8xf32>
    %cst_8 = arith.constant dense<0.000000e+00> : vector<8x8xf32>
    %22 = tpu.matmul %20, %21, %cst_8 {dimension_numbers = #tpu.dot_dimension_numbers<[1], [1], [0], [0], [0, 0, 1, 0], [], []>} : vector<8x8xf32>, vector<8x8xf32>, vector<8x8xf32> -> vector<8x8xf32>
    %23 = arith.addf %22, %1 : vector<8x8xf32>
    %24 = vector.extract_strided_slice %12 {offsets = [0, 16], sizes = [8, 8], strides = [1, 1]} : vector<8x32xf32> to vector<8x8xf32>
    %25 = vector.extract_strided_slice %13 {offsets = [0, 16], sizes = [8, 8], strides = [1, 1]} : vector<8x32xf32> to vector<8x8xf32>
    %cst_9 = arith.constant dense<0.000000e+00> : vector<8x8xf32>
    %26 = tpu.matmul %24, %25, %cst_9 {dimension_numbers = #tpu.dot_dimension_numbers<[1], [1], [0], [0], [0, 0, 1, 0], [], []>} : vector<8x8xf32>, vector<8x8xf32>, vector<8x8xf32> -> vector<8x8xf32>
    %27 = arith.addf %26, %1 : vector<8x8xf32>
    %28 = vector.extract_strided_slice %12 {offsets = [0, 24], sizes = [8, 8], strides = [1, 1]} : vector<8x32xf32> to vector<8x8xf32>
    %29 = vector.extract_strided_slice %13 {offsets = [0, 24], sizes = [8, 8], strides = [1, 1]} : vector<8x32xf32> to vector<8x8xf32>
    %cst_10 = arith.constant dense<0.000000e+00> : vector<8x8xf32>
    %30 = tpu.matmul %28, %29, %cst_10 {dimension_numbers = #tpu.dot_dimension_numbers<[1], [1], [0], [0], [0, 0, 1, 0], [], []>} : vector<8x8xf32>, vector<8x8xf32>, vector<8x8xf32> -> vector<8x8xf32>
    %31 = arith.addf %30, %1 : vector<8x8xf32>
    %cst_11 = arith.constant 0.000000e+00 : f32
    %32 = vector.broadcast %cst_11 : f32 to vector<8x32xf32>
    %cst_12 = arith.constant dense<0xFF800000> : vector<8xf32>
    %33 = vector.multi_reduction <maximumf>, %19, %cst_12 [1] : vector<8x8xf32> to vector<8xf32>
    %34 = vector.shape_cast %33 : vector<8xf32> to vector<8x1xf32>
    %35 = vector.broadcast %34 : vector<8x1xf32> to vector<8x8xf32>
    %36 = arith.subf %19, %35 : vector<8x8xf32>
    %37 = math.exp %36 : vector<8x8xf32>
    %cst_13 = arith.constant dense<0.000000e+00> : vector<8xf32>
    %38 = vector.multi_reduction <add>, %37, %cst_13 [1] : vector<8x8xf32> to vector<8xf32>
    %39 = vector.shape_cast %38 : vector<8xf32> to vector<8x1xf32>
    %40 = tpu.reciprocal %39 : vector<8x1xf32> -> vector<8x1xf32>
    %41 = vector.broadcast %40 : vector<8x1xf32> to vector<8x8xf32>
    %42 = arith.mulf %37, %41 : vector<8x8xf32>
    %43 = vector.extract_strided_slice %14 {offsets = [0, 0], sizes = [8, 8], strides = [1, 1]} : vector<8x32xf32> to vector<8x8xf32>
    %cst_14 = arith.constant dense<0.000000e+00> : vector<8x8xf32>
    %44 = tpu.matmul %42, %43, %cst_14 {dimension_numbers = #tpu.dot_dimension_numbers<[1], [0], [0], [1], [0, 0, 1, 1], [], []>} : vector<8x8xf32>, vector<8x8xf32>, vector<8x8xf32> -> vector<8x8xf32>
    %45 = vector.extract_strided_slice %15 {offsets = [0, 0], sizes = [8, 32], strides = [1, 1]} : vector<32x32xf32> to vector<8x32xf32>
    %cst_15 = arith.constant dense<0.000000e+00> : vector<8x32xf32>
    %46 = tpu.matmul %44, %45, %cst_15 {dimension_numbers = #tpu.dot_dimension_numbers<[1], [0], [0], [1], [0, 0, 1, 1], [], []>} : vector<8x8xf32>, vector<8x32xf32>, vector<8x32xf32> -> vector<8x32xf32>
    %47 = arith.addf %32, %46 : vector<8x32xf32>
    %cst_16 = arith.constant dense<0xFF800000> : vector<8xf32>
    %48 = vector.multi_reduction <maximumf>, %23, %cst_16 [1] : vector<8x8xf32> to vector<8xf32>
    %49 = vector.shape_cast %48 : vector<8xf32> to vector<8x1xf32>
    %50 = vector.broadcast %49 : vector<8x1xf32> to vector<8x8xf32>
    %51 = arith.subf %23, %50 : vector<8x8xf32>
    %52 = math.exp %51 : vector<8x8xf32>
    %cst_17 = arith.constant dense<0.000000e+00> : vector<8xf32>
    %53 = vector.multi_reduction <add>, %52, %cst_17 [1] : vector<8x8xf32> to vector<8xf32>
    %54 = vector.shape_cast %53 : vector<8xf32> to vector<8x1xf32>
    %55 = tpu.reciprocal %54 : vector<8x1xf32> -> vector<8x1xf32>
    %56 = vector.broadcast %55 : vector<8x1xf32> to vector<8x8xf32>
    %57 = arith.mulf %52, %56 : vector<8x8xf32>
    %58 = vector.extract_strided_slice %14 {offsets = [0, 8], sizes = [8, 8], strides = [1, 1]} : vector<8x32xf32> to vector<8x8xf32>
    %cst_18 = arith.constant dense<0.000000e+00> : vector<8x8xf32>
    %59 = tpu.matmul %57, %58, %cst_18 {dimension_numbers = #tpu.dot_dimension_numbers<[1], [0], [0], [1], [0, 0, 1, 1], [], []>} : vector<8x8xf32>, vector<8x8xf32>, vector<8x8xf32> -> vector<8x8xf32>
    %60 = vector.extract_strided_slice %15 {offsets = [8, 0], sizes = [8, 32], strides = [1, 1]} : vector<32x32xf32> to vector<8x32xf32>
    %cst_19 = arith.constant dense<0.000000e+00> : vector<8x32xf32>
    %61 = tpu.matmul %59, %60, %cst_19 {dimension_numbers = #tpu.dot_dimension_numbers<[1], [0], [0], [1], [0, 0, 1, 1], [], []>} : vector<8x8xf32>, vector<8x32xf32>, vector<8x32xf32> -> vector<8x32xf32>
    %62 = arith.addf %47, %61 : vector<8x32xf32>
    %cst_20 = arith.constant dense<0xFF800000> : vector<8xf32>
    %63 = vector.multi_reduction <maximumf>, %27, %cst_20 [1] : vector<8x8xf32> to vector<8xf32>
    %64 = vector.shape_cast %63 : vector<8xf32> to vector<8x1xf32>
    %65 = vector.broadcast %64 : vector<8x1xf32> to vector<8x8xf32>
    %66 = arith.subf %27, %65 : vector<8x8xf32>
    %67 = math.exp %66 : vector<8x8xf32>
    %cst_21 = arith.constant dense<0.000000e+00> : vector<8xf32>
    %68 = vector.multi_reduction <add>, %67, %cst_21 [1] : vector<8x8xf32> to vector<8xf32>
    %69 = vector.shape_cast %68 : vector<8xf32> to vector<8x1xf32>
    %70 = tpu.reciprocal %69 : vector<8x1xf32> -> vector<8x1xf32>
    %71 = vector.broadcast %70 : vector<8x1xf32> to vector<8x8xf32>
    %72 = arith.mulf %67, %71 : vector<8x8xf32>
    %73 = vector.extract_strided_slice %14 {offsets = [0, 16], sizes = [8, 8], strides = [1, 1]} : vector<8x32xf32> to vector<8x8xf32>
    %cst_22 = arith.constant dense<0.000000e+00> : vector<8x8xf32>
    %74 = tpu.matmul %72, %73, %cst_22 {dimension_numbers = #tpu.dot_dimension_numbers<[1], [0], [0], [1], [0, 0, 1, 1], [], []>} : vector<8x8xf32>, vector<8x8xf32>, vector<8x8xf32> -> vector<8x8xf32>
    %75 = vector.extract_strided_slice %15 {offsets = [16, 0], sizes = [8, 32], strides = [1, 1]} : vector<32x32xf32> to vector<8x32xf32>
    %cst_23 = arith.constant dense<0.000000e+00> : vector<8x32xf32>
    %76 = tpu.matmul %74, %75, %cst_23 {dimension_numbers = #tpu.dot_dimension_numbers<[1], [0], [0], [1], [0, 0, 1, 1], [], []>} : vector<8x8xf32>, vector<8x32xf32>, vector<8x32xf32> -> vector<8x32xf32>
    %77 = arith.addf %62, %76 : vector<8x32xf32>
    %cst_24 = arith.constant dense<0xFF800000> : vector<8xf32>
    %78 = vector.multi_reduction <maximumf>, %31, %cst_24 [1] : vector<8x8xf32> to vector<8xf32>
    %79 = vector.shape_cast %78 : vector<8xf32> to vector<8x1xf32>
    %80 = vector.broadcast %79 : vector<8x1xf32> to vector<8x8xf32>
    %81 = arith.subf %31, %80 : vector<8x8xf32>
    %82 = math.exp %81 : vector<8x8xf32>
    %cst_25 = arith.constant dense<0.000000e+00> : vector<8xf32>
    %83 = vector.multi_reduction <add>, %82, %cst_25 [1] : vector<8x8xf32> to vector<8xf32>
    %84 = vector.shape_cast %83 : vector<8xf32> to vector<8x1xf32>
    %85 = tpu.reciprocal %84 : vector<8x1xf32> -> vector<8x1xf32>
    %86 = vector.broadcast %85 : vector<8x1xf32> to vector<8x8xf32>
    %87 = arith.mulf %82, %86 : vector<8x8xf32>
    %88 = vector.extract_strided_slice %14 {offsets = [0, 24], sizes = [8, 8], strides = [1, 1]} : vector<8x32xf32> to vector<8x8xf32>
    %cst_26 = arith.constant dense<0.000000e+00> : vector<8x8xf32>
    %89 = tpu.matmul %87, %88, %cst_26 {dimension_numbers = #tpu.dot_dimension_numbers<[1], [0], [0], [1], [0, 0, 1, 1], [], []>} : vector<8x8xf32>, vector<8x8xf32>, vector<8x8xf32> -> vector<8x8xf32>
    %90 = vector.extract_strided_slice %15 {offsets = [24, 0], sizes = [8, 32], strides = [1, 1]} : vector<32x32xf32> to vector<8x32xf32>
    %cst_27 = arith.constant dense<0.000000e+00> : vector<8x32xf32>
    %91 = tpu.matmul %89, %90, %cst_27 {dimension_numbers = #tpu.dot_dimension_numbers<[1], [0], [0], [1], [0, 0, 1, 1], [], []>} : vector<8x8xf32>, vector<8x32xf32>, vector<8x32xf32> -> vector<8x32xf32>
    %92 = arith.addf %77, %91 : vector<8x32xf32>
    %93 = arith.addf %92, %0 : vector<8x32xf32>
    %cst_28 = arith.constant dense<0.000000e+00> : vector<8xf32>
    %94 = vector.multi_reduction <add>, %93, %cst_28 [1] : vector<8x32xf32> to vector<8xf32>
    %95 = vector.shape_cast %94 : vector<8xf32> to vector<8x1xf32>
    %cst_29 = arith.constant 3.200000e+01 : f32
    %96 = vector.broadcast %cst_29 : f32 to vector<8x1xf32>
    %97 = arith.divf %95, %96 : vector<8x1xf32>
    %98 = vector.broadcast %97 : vector<8x1xf32> to vector<8x32xf32>
    %99 = arith.subf %93, %98 : vector<8x32xf32>
    %100 = arith.mulf %99, %99 : vector<8x32xf32>
    %cst_30 = arith.constant dense<0.000000e+00> : vector<8xf32>
    %101 = vector.multi_reduction <add>, %100, %cst_30 [1] : vector<8x32xf32> to vector<8xf32>
    %102 = vector.shape_cast %101 : vector<8xf32> to vector<8x1xf32>
    %cst_31 = arith.constant 3.200000e+01 : f32
    %103 = vector.broadcast %cst_31 : f32 to vector<8x1xf32>
    %104 = arith.divf %102, %103 : vector<8x1xf32>
    %cst_32 = arith.constant 9.99999974E-6 : f32
    %105 = vector.broadcast %cst_32 : f32 to vector<8x1xf32>
    %106 = arith.addf %104, %105 : vector<8x1xf32>
    %107 = math.rsqrt %106 : vector<8x1xf32>
    %108 = vector.broadcast %107 : vector<8x1xf32> to vector<8x32xf32>
    %109 = arith.mulf %99, %108 : vector<8x32xf32>
    %110 = vector.broadcast %4 : vector<1x32xf32> to vector<8x32xf32>
    %111 = arith.mulf %109, %110 : vector<8x32xf32>
    %112 = vector.broadcast %5 : vector<1x32xf32> to vector<8x32xf32>
    %113 = arith.addf %111, %112 : vector<8x32xf32>
    %c0_33 = arith.constant 0 : index
    %c0_34 = arith.constant 0 : index
    %114 = vector.load %arg4[%c0_33, %c0_34] : memref<64x128xf32, #tpu.memory_space<vmem>>, vector<64x128xf32>
    %115 = vector.extract_strided_slice %114 {offsets = [0, 0], sizes = [32, 64], strides = [1, 1]} : vector<64x128xf32> to vector<32x64xf32>
    %116 = vector.extract_strided_slice %114 {offsets = [0, 64], sizes = [64, 32], strides = [1, 1]} : vector<64x128xf32> to vector<64x32xf32>
    %cst_35 = arith.constant dense<0.000000e+00> : vector<8x64xf32>
    %117 = tpu.matmul %113, %115, %cst_35 {dimension_numbers = #tpu.dot_dimension_numbers<[1], [0], [0], [1], [0, 0, 1, 1], [], []>} : vector<8x32xf32>, vector<32x64xf32>, vector<8x64xf32> -> vector<8x64xf32>
    %118 = vector.broadcast %8 : vector<1x64xf32> to vector<8x64xf32>
    %119 = arith.addf %117, %118 : vector<8x64xf32>
    %cst_36 = arith.constant 5.000000e-01 : f32
    %120 = vector.broadcast %cst_36 : f32 to vector<8x64xf32>
    %121 = arith.mulf %120, %119 : vector<8x64xf32>
    %cst_37 = arith.constant 0.707106769 : f32
    %122 = vector.broadcast %cst_37 : f32 to vector<8x64xf32>
    %123 = arith.mulf %119, %122 : vector<8x64xf32>
    %124 = math.erf %123 : vector<8x64xf32>
    %cst_38 = arith.constant 1.000000e+00 : f32
    %125 = vector.broadcast %cst_38 : f32 to vector<8x64xf32>
    %126 = arith.addf %125, %124 : vector<8x64xf32>
    %127 = arith.mulf %121, %126 : vector<8x64xf32>
    %cst_39 = arith.constant dense<0.000000e+00> : vector<8x32xf32>
    %128 = tpu.matmul %127, %116, %cst_39 {dimension_numbers = #tpu.dot_dimension_numbers<[1], [0], [0], [1], [0, 0, 1, 1], [], []>} : vector<8x64xf32>, vector<64x32xf32>, vector<8x32xf32> -> vector<8x32xf32>
    %129 = vector.broadcast %9 : vector<1x32xf32> to vector<8x32xf32>
    %130 = arith.addf %128, %129 : vector<8x32xf32>
    %131 = arith.addf %130, %113 : vector<8x32xf32>
    %cst_40 = arith.constant dense<0.000000e+00> : vector<8xf32>
    %132 = vector.multi_reduction <add>, %131, %cst_40 [1] : vector<8x32xf32> to vector<8xf32>
    %133 = vector.shape_cast %132 : vector<8xf32> to vector<8x1xf32>
    %cst_41 = arith.constant 3.200000e+01 : f32
    %134 = vector.broadcast %cst_41 : f32 to vector<8x1xf32>
    %135 = arith.divf %133, %134 : vector<8x1xf32>
    %136 = vector.broadcast %135 : vector<8x1xf32> to vector<8x32xf32>
    %137 = arith.subf %131, %136 : vector<8x32xf32>
    %138 = arith.mulf %137, %137 : vector<8x32xf32>
    %cst_42 = arith.constant dense<0.000000e+00> : vector<8xf32>
    %139 = vector.multi_reduction <add>, %138, %cst_42 [1] : vector<8x32xf32> to vector<8xf32>
    %140 = vector.shape_cast %139 : vector<8xf32> to vector<8x1xf32>
    %cst_43 = arith.constant 3.200000e+01 : f32
    %141 = vector.broadcast %cst_43 : f32 to vector<8x1xf32>
    %142 = arith.divf %140, %141 : vector<8x1xf32>
    %cst_44 = arith.constant 9.99999974E-6 : f32
    %143 = vector.broadcast %cst_44 : f32 to vector<8x1xf32>
    %144 = arith.addf %142, %143 : vector<8x1xf32>
    %145 = math.rsqrt %144 : vector<8x1xf32>
    %146 = vector.broadcast %145 : vector<8x1xf32> to vector<8x32xf32>
    %147 = arith.mulf %137, %146 : vector<8x32xf32>
    %148 = vector.broadcast %6 : vector<1x32xf32> to vector<8x32xf32>
    %149 = arith.mulf %147, %148 : vector<8x32xf32>
    %150 = vector.broadcast %7 : vector<1x32xf32> to vector<8x32xf32>
    %151 = arith.addf %149, %150 : vector<8x32xf32>
    %c0_45 = arith.constant 0 : index
    %c0_46 = arith.constant 0 : index
    %152 = vector.load %arg6[%c0_45, %c0_46] : memref<8x32xf32, #tpu.memory_space<vmem>>, vector<8x32xf32>
    tpu.vector_store %arg6[%c0_45, %c0_46], %151 {strides = array<i32>} : memref<8x32xf32, #tpu.memory_space<vmem>>, vector<8x32xf32>,
    return
  }
  func.func @transform_0(%arg0: i32) -> (i32, i32) {
    %c0_i32 = arith.constant 0 : i32
    %c0_i32_0 = arith.constant 0 : i32
    return %arg0, %c0_i32 : i32, i32
  }
  func.func @transform_1(%arg0: i32) -> (i32, i32) {
    %c0_i32 = arith.constant 0 : i32
    %c0_i32_0 = arith.constant 0 : i32
    %c0_i32_1 = arith.constant 0 : i32
    return %c0_i32, %c0_i32_0 : i32, i32
  }
  func.func @transform_2(%arg0: i32) -> (i32, i32) {
    %c0_i32 = arith.constant 0 : i32
    %c0_i32_0 = arith.constant 0 : i32
    %c0_i32_1 = arith.constant 0 : i32
    return %c0_i32, %c0_i32_0 : i32, i32
  }
  func.func @transform_3(%arg0: i32) -> (i32, i32) {
    %c0_i32 = arith.constant 0 : i32
    %c0_i32_0 = arith.constant 0 : i32
    %c0_i32_1 = arith.constant 0 : i32
    return %c0_i32, %c0_i32_0 : i32, i32
  }
  func.func @transform_4(%arg0: i32) -> (i32, i32) {
    %c0_i32 = arith.constant 0 : i32
    %c0_i32_0 = arith.constant 0 : i32
    %c0_i32_1 = arith.constant 0 : i32
    return %c0_i32, %c0_i32_0 : i32, i32
  }
  func.func @transform_5(%arg0: i32) -> (i32, i32) {
    %c0_i32 = arith.constant 0 : i32
    %c0_i32_0 = arith.constant 0 : i32
    return %arg0, %c0_i32 : i32, i32
  }
}

</mosaic_0001>

<bundles_post_ra>
// kernel: tpu_custom_call.1
= control target key start
LH: loop header
LB: loop body
LE: loop exit
PB: predicated region body
PF: predicated region fallthrough
CT: control target
= control target key end

     0   :  { %10 = vsyncpa [#allocation3], 0  ;;  %s1815_s0 = inlined_call_operand.hbm [shape: f32[16,32], index: 0, kind: input, shape index: {}]   ;;  %s1816_s1 = inlined_call_operand.hbm [shape: f32[8,8], index: 1, kind: input, shape index: {}]   ;;  %s1817_s2 = inlined_call_operand.hbm [shape: f32[32,128], index: 2, kind: input, shape index: {}]   ;;  %s1818_s3 = inlined_call_operand.hbm [shape: f32[64,128], index: 3, kind: input, shape index: {}]   ;;  %s1819_s4 = inlined_call_operand.hbm [shape: f32[8,128], index: 4, kind: input, shape index: {}]   ;;  %s1820_s5 = inlined_call_operand.hbm [shape: f32[16,32], index: 5, kind: output, shape index: {}]  }
   0x1   :  { %12 = vsyncpa [#allocation3 + $0x1], 0 }
   0x2   :  { %13 = vsyncpa [#allocation6], 0 }
   0x3   :  { %14 = vsyncpa [#allocation9], 0 }
   0x4   :  { %15 = vsyncpa [#allocation4], 0 }
   0x5   :  { %17 = vsyncpa [#allocation4 + $0x1], 0  ;;  %s1542_s18 = smov 0   ;;  %s1544_s19 = smov 0  }
   0x6   :  { %s1546_s20 = smov 0   ;;  %s1548_s21 = smov 0  }
   0x7 LB: > { %s176_s24 = sshll.u32 %s1816_s1, 4  ;;  %s1566_s25 = sadd.s32 4294967295, %s1491_s21   ;;  %s1491_s21 = sphi %s1548_s21, %s1832_s21   ;;  %s1487_s20 = sphi %s1546_s20, %s1831_s20   ;;  %s1483_s19 = sphi %s1544_s19, %s1830_s19   ;;  %s1479_s18 = sphi %s1542_s18, %s1829_s18   ;;  %s177_s24 = int_to_ptr.hbm [resolvable:$true] %s176_s24 }
   0x8   : > { %p1077_p0 = scmp.ge.s32.totalorder %s1491_s21, 1  ;;  %p44_p1 = scmp.eq.s32.totalorder %s1566_s25, 0 }
   0x9   : > { %p164_p2 = scmp.lt.s32.totalorder %s1491_s21, 3  ;;  %s1493_s27 = smov [#allocation5]  }
   0xa   : > { %s178_s28 = sshll.u32 %s1493_s27, 4  ;;  %s201_s6 = sshll.u32 %s1818_s3, 4  ;;  %s179_s28 = int_to_ptr.vmem [resolvable:$true] %s178_s28  ;;  %s202_s6 = int_to_ptr.hbm [resolvable:$true] %s201_s6 }
   0xb   : > { %p1571_p3 = pnand %p1077_p0, %p164_p2  ;;  %s187_s10 = sshll.u32 %s1817_s2, 4  ;;  %s188_s10 = int_to_ptr.hbm [resolvable:$true] %s187_s10 }
   0xc   : > { %s1494_s11 = smov [#allocation8]   ;;  %s1495_s13 = smov 128  }
   0xd   : > { %p1136_p5 = pneg %p1571_p3  ;;  %s203_s12 = sshll.u32 %s1494_s11, 4  ;;  %s204_s12 = int_to_ptr.vmem [resolvable:$true] %s203_s12 }
   0xe   : > { %s1496_s14 = smov 8   ;;  %s216_s17 = sshll.u32 %s1819_s4, 4  ;;  %s217_s17 = int_to_ptr.hbm [resolvable:$true] %s216_s17 }
   0xf   : > { %p1583_p6 = pnand %p1136_p5, %p44_p1  ;;  %s1497_s22 = smov [#allocation7]  }
  0x10   : > { %s189_s23 = sshll.u32 %s1497_s22, 4  ;;  %s1603_s29 = sadd.s32 1, %s1491_s21   ;;  %s190_s23 = int_to_ptr.vmem [resolvable:$true] %s189_s23 }
  0x11   : > { %1139 = dma.hbm_to_vmem [thread:$0]  (!%p1583_p6), %s177_s24, 128, %s179_s28, [#allocation6]  }
  0x12   : > { %1145 = dma.hbm_to_vmem [thread:$0]  (!%p1583_p6), %s202_s6, 1024, %s204_s12, [#allocation9], %s1495_s13, %s1495_s13, %s1496_s14  }
  0x13   : > { %1142 = dma.hbm_to_vmem [thread:$0]  (!%p1583_p6), %s188_s10, 512, %s190_s23, [#allocation6], %s1495_s13, %s1495_s13, %s1496_s14  }
  0x14   : > { %s1498_s24 = smov [#allocation10]   ;;  %s1076_s28 = sadd.s32 4294967294, %s1491_s21  }
  0x15   : > { %s218_s27 = sshll.u32 %s1498_s24, 4  ;;  %s27_s30 = ssub.s32 %s1491_s21, %s1603_s29  ;;  %s219_s27 = int_to_ptr.vmem [resolvable:$true] %s218_s27 }
  0x16   : > { %1148 = dma.hbm_to_vmem [thread:$0]  (!%p1583_p6), %s217_s17, 128, %s219_s27, [#allocation9]  }
  0x17   : > { %s30_s6 = sadd.s32 1, %s1487_s20  ;;  %p28_p7 = scmp.eq.s32.totalorder %s27_s30, 0 }
  0x18   : > { %p37_p8 = scmp.ne.s32.totalorder %s1487_s20, %s1483_s19  ;;  %p38_p9 = scmp.eq.s32.totalorder %s1491_s21, 0 }
  0x19   : > { %p43_p10 = scmp.ne.s32.totalorder %s1483_s19, %s1479_s18  ;;  %p151_p13 = scmp.eq.s32.totalorder %s1566_s25, 1 }
  0x1a   : > { %s1614_s8 = scalar_select %p28_p7, %s1487_s20, %s30_s6  }
  0x1b   : > { %p1616_p11 = por %p38_p9, %p37_p8  ;;  %p1622_p12 = por %p44_p1, %p43_p10 }
  0x1c   : > { %p157_p0 = scmp.eq.s32.totalorder %s1076_s28, 1  ;;  %p1161_p2 = scmp.lt.s32.totalorder %s1491_s21, 2 }
  0x1d   : > { %s229_s10 = sand.u32 1, %s1487_s20   ;;  %p1629_p5 = por %p151_p13, %p37_p8 }
  0x1e   : > { %p1633_p6 = por %p157_p0, %p43_p10  ;;  %s1083_s13 = sshll.u32 %s229_s10, 3 }
  0x1f   : > { %s1084_s14 = sshll.u32 %s1491_s21, 3  ;;  %s233_s22 = scalar_lea.vmem [#allocation2], %s1083_s13 }
  0x20   : > { %s237_s17 = scalar_lea.hbm %s1815_s0, %s1084_s14  ;;  %s241_s23 = sshll.u32 %s233_s22, 4  ;;  %s242_s23 = int_to_ptr.vmem [resolvable:$true] %s241_s23 }
  0x21   : > { %s239_s24 = sshll.u32 %s237_s17, 4  ;;  %p1643_p7 = pnand %p1161_p2, %p1616_p11  ;;  %s240_s24 = int_to_ptr.hbm [resolvable:$true] %s239_s24 }
  0x22   : > { %s230_s28 = scalar_lea.sflag [#allocation3], %s229_s10  ;;  %s1387_s30 = sshra.s32 %s240_s24, 4  ;;  %s1388_s30 = int_to_ptr.hbm [resolvable:$true] %s1387_s30 }
  0x23   : > { %s1389_s6 = scalar_lea.hbm %s1388_s30, 8  ;;  %p1391_p9 = pneg %p1643_p7 }
  0x24   : > { %p1390_p8 = scmp.ne.s32.totalorder %s1388_s30, %s1389_s6  ;;  %s1394_s15 = scalar_lea.hbm %s1815_s0, 16 }
  0x25   : > { %p1395_p11 = scmp.lt.s32.totalorder %s1388_s30, %s1815_s0  ;;  %p1396_p0 = scmp.lt.s32.totalorder %s1394_s15, %s1389_s6 }
  0x26   : > { %p1392_p10 = pnand %p1391_p9, %p1390_p8 }
  0x27   : > { %p1397_p2 = por %p1396_p0, %p1395_p11 }
  0x28   : > { %p1393_p13 = pneg %p1392_p10 }
  0x2a   : > { %p1398_p4 = pnand %p1397_p2, %p1393_p13 }
  0x2c   : > { %1401 = shalt.err (!%p1398_p4)
}
  0x2d   : > { %1152 = dma.hbm_to_vmem [thread:$0]  (!%p1643_p7), %s240_s24, 128, %s242_s23, %s230_s28  }
  0x2e   : > { %250 = sbr.rel (%p1571_p3) target bundleno = 1984 (0x7c0), region = 40  ;;  %s1660_s10 = sand.u32 (!%p1571_p3), 1, %s1483_s19  }
  0x2f   : > { %s1086_s17 = sshll.u32 (!%p1571_p3), %s1660_s10, 3  ;;  %s253_s22 = scalar_lea.sflag (!%p1571_p3), [#allocation3], %s1660_s10 }
  0x30   : > { %s256_s30 = scalar_lea.vmem (!%p1571_p3), [#allocation2], %s1086_s17 }
  0x33   : > { %1462 = dma.done.wait (%p1622_p12), %s253_s22, 128  }
  0x34   : > { %1464 = vsyncadd (%p1622_p12), %s253_s22, 4294967168 }
  0x35   : > { %1466 = dma.done.wait (%p44_p1), [#allocation6], 640  }
  0x36   : > { %1468 = vsyncadd (%p44_p1), [#allocation6], 4294966656 }
  0x37   : > { %1470 = dma.done.wait (%p44_p1), [#allocation9], 1152  }
  0x38   : > { %1472 = vsyncadd (%p44_p1), [#allocation9], 4294966144  ;;  %v1678_v0 = vld [vmem:[#allocation7 + $0x18] sm:$0xff]  ;;  %v1680_v1 = vld [vmem:[#allocation7 + $0x10] sm:$0xff]  ;;  %vm311_vm0 = vcmask 261120   ;;  %s1499_s26 = smov 112  }
  0x39   : > { %327 = vmatpush.msra.mxu0 %v1678_v0  ;;  %v1683_v2 = vld [vmem:[#allocation7] sm:$0xff]  ;;  %v1685_v3 = vld [vmem:[#allocation7 + $0x8] sm:$0xff]  ;;  %s1500_s7 = smov 96   ;;  %s1501_s23 = smov 88   ;;  %vm338_vm1 = vcmask 64512   ;;  %v305_v15 = vld [vmem:[#allocation5] sm:$0xff] }
  0x3a   : > { %v1218_v4 = vpack.i.bf16 %v1680_v1, %v1683_v2  ;;  %v1691_v5 = vld [vmem:[%s256_s30] sm:$0xff]  ;;  %s1502_s24 = smov 72   ;;  %s1503_s27 = smov 80  }
  0x3b   : > { %328 = vmatpush.msra.mxu0 %v1680_v1  ;;  %s1504_s28 = smov 120   ;;  %s1505_s6 = smov 104  }
  0x3c   : > { %s1506_s13 = smov 56   ;;  %s1507_s14 = smov 32  }
  0x3d   : > { %329 = vmatpush.msra.mxu0 %v1685_v3  ;;  %s1508_s15 = smov 64   ;;  %s1509_s16 = smov 40  }
  0x3e   : > { %s1510_s9 = smov 48   ;;  %s1113_s22 = sshll.u32 %s1566_s25, 3 }
  0x3f   : > { %330 = vmatpush.msra.mxu0 %v1683_v2  ;;  %s953_s25 = scalar_lea.sflag [#allocation4], %s1660_s10 }
  0x40   : > { %1092 = vmatmul.msk.f32.vlgmr.msra.gmra.mxu0 %vm311_vm0, %v1691_v5 }
  0xbd   : > { %v1696_v6 = vpop.f32.mrf.mxu0 }
  0xbe   : > { %391 = vrot.lane.b32.xlu2 %v1696_v6, %s1499_s26  ;;  %336 = vrot.lane.b32.xlu1 %v1696_v6, %s1500_s7  ;;  %s963_s7 = scalar_lea.hbm %s1820_s5, %s1113_s22 }
  0xbf   : > { %365 = vrot.lane.b32.xlu0 %v1696_v6, %s1501_s23  ;;  %s303_s23 = scalar_lea.vmem [#allocation11], %s1086_s17  ;;  %s1437_s17 = scalar_lea.hbm %s1820_s5, 16 }
  0xc6   : > { %421 = vrot.lane.b32.xlu2 %v1696_v6, %s1502_s24  ;;  %393 = vrot.lane.b32.xlu1 %v1696_v6, %s1503_s27  ;;  %s965_s24 = sshll.u32 %s303_s23, 4  ;;  %s967_s27 = sshll.u32 %s963_s7, 4  ;;  %s966_s24 = int_to_ptr.vmem [resolvable:$true] %s965_s24  ;;  %s968_s27 = int_to_ptr.hbm [resolvable:$true] %s967_s27 }
  0xc7   : > { %363 = vrot.lane.b32.xlu0 %v1696_v6, %s1504_s28  ;;  %s1431_s28 = sshra.s32 %s968_s27, 4  ;;  %s1432_s28 = int_to_ptr.hbm [resolvable:$true] %s1431_s28 }
  0xc8   : > { %p1438_p12 = scmp.lt.s32.totalorder %s1432_s28, %s1820_s5 }
  0xcf   : > { %419 = vrot.lane.b32.xlu0 %v1696_v6, %s1505_s6  ;;  %s1433_s6 = scalar_lea.hbm %s1432_s28, 8 }
  0xd0   : > { %p1434_p1 = scmp.ne.s32.totalorder %s1432_s28, %s1433_s6  ;;  %p1439_p7 = scmp.lt.s32.totalorder %s1437_s17, %s1433_s6 }
  0xd2   : > { %p1435_p3 = pnand %p1434_p1, %p1629_p5  ;;  %p1440_p8 = por %p1439_p7, %p1438_p12 }
  0xd4   : > { %p1436_p4 = pneg %p1435_p3 }
  0xd6   : > { %p1441_p9 = pnand %p1440_p8, %p1436_p4 }
  0xd7   : > { %521 = vrot.lane.b32.xlu0 %v1696_v6, %s1506_s13 }
 0x118   : > { %v392_v7 = vpop.permute.xlu2 %391 }
 0x120   : > { %v422_v9 = vpop.permute.xlu2 %421 }
 0x130   : > { %v337_v8 = vpop.permute.xlu1 %336 }
 0x131   : > { %v366_v10 = vpop.permute.xlu0 %365  ;;  %1093 = vmatpush.xpose.msk.msra.mxu1 %vm338_vm1, %v337_v8 }
 0x132   : > { %1095 = vmatpush.xpose.msk.msra.mxu2 %vm338_vm1, %v366_v10 }
 0x134   : > { %1094 = vmatmul.msk.f32.vlgmr.msra.gmra.mxu1 %vm338_vm1, %v1696_v6 }
 0x135   : > { %1099 = vmatpush.xpose.msk.msrb.mxu1 %vm338_vm1, %v422_v9 }
 0x138   : > { %v394_v11 = vpop.permute.xlu1 %393 }
 0x139   : > { %v364_v12 = vpop.permute.xlu0 %363  ;;  %1097 = vmatpush.xpose.msk.msrb.mxu0 %vm338_vm1, %v394_v11 }
 0x13a   : > { %1096 = vmatmul.msk.f32.vlgmr.msra.gmra.mxu2 %vm338_vm1, %v364_v12 }
 0x13c   : > { %1098 = vmatmul.msk.f32.vlgmr.msrb.gmra.mxu0 %vm338_vm1, %v392_v7 }
 0x141   : > { %v420_v13 = vpop.permute.xlu0 %419 }
 0x142   : > { %1100 = vmatmul.msk.f32.vlgmr.msrb.gmra.mxu1 %vm338_vm1, %v420_v13 }
 0x149   : > { %v522_v14 = vpop.permute.xlu0 %521 }
 0x14a   : > { %542 = vmatpush.msra.mxu3 %v522_v14 }
 0x1b1   : > { %v360_v16 = vpop.f32.mrf.mxu1 }
 0x1b2   : > { %v361_v17 = vadd.f32 %v360_v16, %v305_v15 }
 0x1b4   : > { %v447_v18 = vsel %vm338_vm1, %v361_v17, -inf }
 0x1b5   : > { %448 = vmax.xlane.f32.xlu0 %v447_v18 }
 0x1b9   : > { %v416_v35 = vpop.f32.mrf.mxu0 }
 0x1ba   : > { %v417_v37 = vadd.f32 %v416_v35, %v305_v15 }
 0x1bc   : > { %v601_v39 = vsel %vm338_vm1, %v417_v37, -inf }
 0x1bd   : > { %v388_v19 = vpop.f32.mrf.mxu2 }
 0x1be   : > { %v389_v20 = vadd.f32 %v388_v19, %v305_v15 }
 0x1bf   : > { %v444_v22 = vpop.f32.mrf.mxu1 }
 0x1c0   : > { %v497_v21 = vsel %vm338_vm1, %v389_v20, -inf  ;;  %v445_v23 = vadd.f32 %v444_v22, %v305_v15 }
 0x1c1   : > { %498 = vmax.xlane.f32.xlu1 %v497_v21 }
 0x1c2   : > { %v679_v24 = vsel %vm338_vm1, %v445_v23, -inf }
 0x1c9   : > { %680 = vmax.xlane.f32.xlu1 %v679_v24 }
 0x228   : > { %v449_v28 = vpop.xlane.xlu0 %448 }
 0x229   : > { %v450_v32 = vsub.f32 %v361_v17, %v449_v28 }
 0x22b   : > { %v451_v36 = vmul.f32 1.442695, %v450_v32 }
 0x234   : > { %v499_v25 = vpop.xlane.xlu1 %498 }
 0x235   : > { %v500_v26 = vsub.f32 %v389_v20, %v499_v25 }
 0x237   : > { %v501_v27 = vmul.f32 1.442695, %v500_v26 }
 0x239   : > { %1243 = vpow2.f32 %v501_v27 }
 0x23c   : > { %v681_v29 = vpop.xlane.xlu1 %680 }
 0x23d   : > { %v682_v30 = vsub.f32 %v445_v23, %v681_v29 }
 0x23f   : > { %v1244_v31 = vpop.eup %1243  ;;  %v683_v33 = vmul.f32 1.442695, %v682_v30 }
 0x240   : > { %v503_v34 = vsel %vm338_vm1, %v1244_v31, 0.0 }
 0x241   : > { %1245 = vpow2.f32 %v683_v33  ;;  %504 = vadd.xlane.f32.xlu2 %v503_v34 }
 0x242   : > { %1247 = vpow2.f32 %v451_v36 }
 0x247   : > { %v1719_v38 = vpop.eup %1245 }
 0x248   : > { %v685_v40 = vsel %vm338_vm1, %v1719_v38, 0.0  ;;  %v1248_v41 = vpop.eup %1247 }
 0x249   : > { %602 = vmax.xlane.f32.xlu2 %v601_v39  ;;  %686 = vadd.xlane.f32.xlu0 %v685_v40  ;;  %v453_v42 = vsel %vm338_vm1, %v1248_v41, 0.0 }
 0x251   : > { %454 = vadd.xlane.f32.xlu2 %v453_v42 }
 0x25d   : > { %548 = vrot.lane.b32.xlu0 %v1685_v3, %s1507_s14 }
 0x265   : > { %730 = vrot.lane.b32.xlu0 %v1678_v0, %s1507_s14 }
 0x269   : > { %471 = vrot.lane.b32.xlu2 %v1696_v6, %s1508_s15 }
 0x271   : > { %703 = vrot.lane.b32.xlu2 %v1696_v6, %s1509_s16 }
 0x2b4   : > { %v505_v43 = vpop.xlane.xlu2 %504 }
 0x2b5   : > { %1249 = vrcp.f32 %v505_v43  ;;  %v517_v51 = vand.u32 2147483648, %v505_v43  ;;  %v515_v52 = vand.u32 2147483647, %v505_v43  ;;  %vm511_vm3 = vweird.f32 %v505_v43 }
 0x2b7   : > { %v518_v54 = vor.u32 1.1754944e-38, %v517_v51  ;;  %vm516_vm5 = vcmp.eq.f32.partialorder %v515_v52, 8.507059e+37 }
 0x2bb   : > { %v1250_v44 = vpop.eup %1249 }
 0x2bc   : > { %v507_v45 = vmul.f32 %v1250_v44, %v505_v43  ;;  %v603_v46 = vpop.xlane.xlu2 %602  ;;  %vm512_vm2 = vweird.f32 %v1250_v44  ;;  %v687_v59 = vpop.xlane.xlu0 %686 }
 0x2bd   : > { %v604_v47 = vsub.f32 %v417_v37, %v603_v46  ;;  %vm513_vm4 = vmor %vm511_vm3, %vm512_vm2  ;;  %v699_v27 = vand.u32 2147483648, %v687_v59  ;;  %vm693_vm12 = vweird.f32 %v687_v59  ;;  %v697_v28 = vand.u32 2147483647, %v687_v59 }
 0x2be   : > { %v508_v48 = vsub.f32 1.0, %v507_v45 }
 0x2bf   : > { %v605_v49 = vmul.f32 1.442695, %v604_v47  ;;  %v700_v30 = vor.u32 1.1754944e-38, %v699_v27  ;;  %vm698_vm2 = vcmp.eq.f32.partialorder %v697_v28, 8.507059e+37 }
 0x2c0   : > { %v509_v50 = vmul.f32 %v1250_v44, %v508_v48 }
 0x2c1   : > { %1251 = vpow2.f32 %v605_v49 }
 0x2c2   : > { %v510_v53 = vadd.f32 %v1250_v44, %v509_v50 }
 0x2c4   : > { %v455_v55 = vpop.xlane.xlu2 %454  ;;  %v514_v56 = vsel %vm513_vm4, %v1250_v44, %v510_v53 }
 0x2c5   : > { %1253 = vrcp.f32 %v455_v55  ;;  %v519_v57 = vsel %vm516_vm5, %v518_v54, %v514_v56  ;;  %v467_v7 = vand.u32 2147483648, %v455_v55  ;;  %v465_v10 = vand.u32 2147483647, %v455_v55 }
 0x2c6   : > { %v520_v60 = vmul.f32 %v1244_v31, %v519_v57  ;;  %vm461_vm7 = vweird.f32 %v455_v55  ;;  %1255 = vrcp.f32 %v687_v59  ;;  %v1511_v54 = vmov 32.0  }
 0x2c7   : > { %v1732_v58 = vpop.eup %1251  ;;  %v468_v12 = vor.u32 1.1754944e-38, %v467_v7  ;;  %vm466_vm9 = vcmp.eq.f32.partialorder %v465_v10, 8.507059e+37  ;;  %v793_v7 = vld [vmem:[#allocation8 + $0x10] sm:$0xff] }
 0x2c8   : > { %v607_v61 = vsel %vm338_vm1, %v1732_v58, 0.0  ;;  %1102 = vmatmul.msk.f32.vlgmr.msra.gmra.mxu3 %vm338_vm1, %v520_v60  ;;  %v797_v10 = vld [vmem:[#allocation8 + $0x30] sm:$0xff] }
 0x2c9   : > { %608 = vadd.xlane.f32.xlu1 %v607_v61 }
 0x2cb   : > { %v1254_v62 = vpop.eup %1253 }
 0x2cc   : > { %v457_v63 = vmul.f32 %v1254_v62, %v455_v55  ;;  %v472_v0 = vpop.permute.xlu2 %471  ;;  %vm462_vm6 = vweird.f32 %v1254_v62  ;;  %v1256_v17 = vpop.eup %1255 }
 0x2cd   : > { %492 = vmatpush.msrb.mxu2 %v472_v0  ;;  %vm463_vm8 = vmor %vm461_vm7, %vm462_vm6  ;;  %v689_v19 = vmul.f32 %v1256_v17, %v687_v59  ;;  %vm694_vm10 = vweird.f32 %v1256_v17 }
 0x2ce   : > { %v458_v3 = vsub.f32 1.0, %v457_v63  ;;  %vm695_vm13 = vmor %vm693_vm12, %vm694_vm10 }
 0x2cf   : > { %v549_v8 = vpop.permute.xlu0 %548  ;;  %v690_v20 = vsub.f32 1.0, %v689_v19 }
 0x2d0   : > { %v459_v9 = vmul.f32 %v1254_v62, %v458_v3  ;;  %569 = vmatpush.msra.mxu0 %v549_v8  ;;  %v794_v3 = vld [vmem:[#allocation8 + $0x18] sm:$0xff]  ;;  %v792_v8 = vld [vmem:[#allocation8 + $0x8] sm:$0xff] }
 0x2d1   : > { %v691_v23 = vmul.f32 %v1256_v17, %v690_v20 }
 0x2d2   : > { %v460_v11 = vadd.f32 %v1254_v62, %v459_v9  ;;  %v791_v9 = vld [vmem:[#allocation8] sm:$0xff] }
 0x2d3   : > { %v692_v26 = vadd.f32 %v1256_v17, %v691_v23  ;;  %v1238_v27 = vpack.i.bf16 %v791_v9, %v792_v8 }
 0x2d4   : > { %v704_v13 = vpop.permute.xlu2 %703  ;;  %v464_v14 = vsel %vm463_vm8, %v1254_v62, %v460_v11  ;;  %v798_v11 = vld [vmem:[#allocation8 + $0x38] sm:$0xff] }
 0x2d5   : > { %724 = vmatpush.msrb.mxu0 %v704_v13  ;;  %v469_v15 = vsel %vm466_vm9, %v468_v12, %v464_v14  ;;  %v696_v29 = vsel %vm695_vm13, %v1256_v17, %v692_v26  ;;  %v1223_v12 = vpack.i.bf16 %v797_v10, %v798_v11 }
 0x2d6   : > { %v470_v16 = vmul.f32 %v1248_v41, %v469_v15  ;;  %v701_v33 = vsel %vm698_vm2, %v700_v30, %v696_v29  ;;  %v795_v15 = vld [vmem:[#allocation8 + $0x20] sm:$0xff] }
 0x2d7   : > { %v702_v35 = vmul.f32 %v1719_v38, %v701_v33  ;;  %v731_v42 = vpop.permute.xlu0 %730  ;;  %1224 = vrot.lane.b32.xlu0 %v1223_v12, %s1508_s15 }
 0x2d8   : > { %1101 = vmatmul.msk.f32.vlgmr.msrb.gmra.mxu2 %vm338_vm1, %v470_v16  ;;  %v796_v16 = vld [vmem:[#allocation8 + $0x28] sm:$0xff] }
 0x2e2   : > { %625 = vrot.lane.b32.xlu1 %v1696_v6, %s1510_s9 }
 0x2ea   : > { %1219 = vrot.lane.b32.xlu1 %v1218_v4, %s1507_s14 }
 0x33c   : > { %v609_v18 = vpop.xlane.xlu1 %608 }
 0x33d   : > { %1257 = vrcp.f32 %v609_v18  ;;  %v621_v1 = vand.u32 2147483648, %v609_v18  ;;  %vm615_vm14 = vweird.f32 %v609_v18  ;;  %v619_v2 = vand.u32 2147483647, %v609_v18 }
 0x33e   : > { %1259 = vrcp.f32 %v1511_v54 }
 0x33f   : > { %v622_v32 = vor.u32 1.1754944e-38, %v621_v1  ;;  %vm620_vm3 = vcmp.eq.f32.partialorder %v619_v2, 8.507059e+37 }
 0x343   : > { %v1258_v21 = vpop.eup %1257 }
 0x344   : > { %v611_v22 = vmul.f32 %v1258_v21, %v609_v18  ;;  %vm616_vm11 = vweird.f32 %v1258_v21  ;;  %v1260_v55 = vpop.eup %1259  ;;  %v1228_v18 = vpack.i.bf16 %v795_v15, %v796_v16 }
 0x345   : > { %vm617_vm15 = vmor %vm615_vm14, %vm616_vm11  ;;  %v762_v56 = vmul.f32 32.0, %v1260_v55  ;;  %vm766_vm4 = vweird.f32 %v1260_v55  ;;  %vm900_vm11 = vcmask 523264  }
 0x346   : > { %v612_v24 = vsub.f32 1.0, %v611_v22  ;;  %1229 = vrot.lane.b32.xlu0 %v1228_v18, %s1508_s15 }
 0x347   : > { %v763_v57 = vsub.f32 1.0, %v762_v56 }
 0x348   : > { %v613_v25 = vmul.f32 %v1258_v21, %v612_v24  ;;  %v1761_v24 = vld [vmem:[#allocation10] sm:$0xff] }
 0x349   : > { %v789_v2 = vperm.slane %v1761_v24, 1  ;;  %v1225_v30 = vpop.permute.xlu0 %1224  ;;  %v799_v33 = vperm.slane %v1761_v24, 4 }
 0x34a   : > { %v614_v6 = vadd.f32 %v1258_v21, %v613_v25 }
 0x34b   : > { %v544_v4 = vpop.f32.mrf.mxu3 }
 0x34c   : > { %1103 = vmatmul.msk.f32.vlgmr.msra.gmra.mxu0 %vm338_vm1, %v544_v4  ;;  %v618_v31 = vsel %vm617_vm15, %v1258_v21, %v614_v6  ;;  %v1233_v21 = vpack.i.bf16 %v793_v7, %v794_v3  ;;  %v787_v6 = vperm.slane %v1761_v24, 0 }
 0x34d   : > { %v623_v34 = vsel %vm620_vm3, %v622_v32, %v618_v31  ;;  %v1226_v31 = vunpack.i.l.bf16 %v1225_v30  ;;  %v1227_v32 = vunpack.i.h.bf16 %v1225_v30 }
 0x34e   : > { %v624_v37 = vmul.f32 %v1732_v58, %v623_v34  ;;  %v764_v58 = vmul.f32 %v1260_v55, %v763_v57  ;;  %1234 = vrot.lane.b32.xlu0 %v1233_v21, %s1508_s15 }
 0x350   : > { %v765_v59 = vadd.f32 %v1260_v55, %v764_v58 }
 0x352   : > { %v1753_v60 = vsel %vm766_vm4, %v1260_v55, %v765_v59 }
 0x354   : > { %v626_v36 = vpop.permute.xlu1 %625  ;;  %1107 = vmatmul.msk.f32.vlgmr.msrb.gmra.mxu0 %vm338_vm1, %v702_v35 }
 0x355   : > { %646 = vmatpush.msra.mxu2 %v626_v36 }
 0x356   : > { %1105 = vmatmul.msk.f32.vlgmr.msra.gmra.mxu2 %vm338_vm1, %v624_v37  ;;  %1239 = vrot.lane.b32.xlu0 %v1238_v27, %s1508_s15 }
 0x357   : > { %815 = vmatpush.msrb.mxu2 %v794_v3 }
 0x359   : > { %816 = vmatpush.msrb.mxu2 %v793_v7 }
 0x35b   : > { %v494_v41 = vpop.f32.mrf.mxu2  ;;  %817 = vmatpush.msrb.mxu2 %v792_v8 }
 0x35c   : > { %v1220_v39 = vpop.permute.xlu1 %1219 }
 0x35d   : > { %v1221_v40 = vunpack.i.l.bf16 %v1220_v39  ;;  %v1222_v43 = vunpack.i.h.bf16 %v1220_v39  ;;  %818 = vmatpush.msrb.mxu2 %v791_v9 }
 0x35f   : > { %596 = vmatpush.msra.mxu1 %v1221_v40  ;;  %673 = vmatpush.msrb.mxu3 %v1222_v43 }
 0x360   : > { %1104 = vmatmul.msk.f32.vlgmr.msra.gmra.mxu1 %vm338_vm1, %v494_v41 }
 0x361   : > { %751 = vmatpush.msrb.mxu1 %v731_v42  ;;  %912 = vmatpush.msra.mxu3 %v1226_v31 }
 0x363   : > { %913 = vmatpush.msra.mxu3 %v1227_v32 }
 0x3b8   : > { %v1230_v34 = vpop.permute.xlu0 %1229 }
 0x3b9   : > { %v1231_v36 = vunpack.i.l.bf16 %v1230_v34  ;;  %v1232_v39 = vunpack.i.h.bf16 %v1230_v34 }
 0x3bb   : > { %914 = vmatpush.msra.mxu3 %v1231_v36 }
 0x3bd   : > { %915 = vmatpush.msra.mxu3 %v1232_v39 }
 0x3c0   : > { %v1235_v43 = vpop.permute.xlu0 %1234 }
 0x3c9   : > { %v571_v44 = vpop.f32.mrf.mxu0 }
 0x3d1   : > { %v726_v38 = vpop.f32.mrf.mxu0 }
 0x3d2   : > { %1108 = vmatmul.msk.f32.vlgmr.msrb.gmra.mxu1 %vm338_vm1, %v726_v38 }
 0x3d9   : > { %v648_v45 = vpop.f32.mrf.mxu2 }
 0x3da   : > { %1106 = vmatmul.msk.f32.vlgmr.msrb.gmra.mxu3 %vm338_vm1, %v648_v45 }
 0x3dd   : > { %v598_v46 = vpop.f32.mrf.mxu1 }
 0x3de   : > { %v599_v47 = vadd.f32 %v598_v46, %v571_v44  ;;  %v1236_v44 = vunpack.i.l.bf16 %v1235_v43  ;;  %v1237_v46 = vunpack.i.h.bf16 %v1235_v43 }
 0x3e0   : > { %916 = vmatpush.msra.mxu3 %v1236_v44  ;;  %v949_v44 = vperm.slane %v1761_v24, 3 }
 0x3e2   : > { %917 = vmatpush.msra.mxu3 %v1237_v46 }
 0x44f   : > { %v753_v50 = vpop.f32.mrf.mxu1 }
 0x45d   : > { %v675_v48 = vpop.f32.mrf.mxu3 }
 0x45e   : > { %v678_v49 = vadd.f32 %v675_v48, %v599_v47 }
 0x460   : > { %v756_v51 = vadd.f32 %v753_v50, %v678_v49 }
 0x462   : > { %v757_v52 = vadd.f32 %v756_v51, %v1691_v5 }
 0x464   : > { %v758_v53 = vsel %vm311_vm0, %v757_v52, 0.0 }
 0x465   : > { %759 = vadd.xlane.f32.xlu2 %v758_v53 }
 0x4d8   : > { %v760_v61 = vpop.xlane.xlu2 %759 }
 0x4d9   : > { %v768_v62 = vmul.f32 %v1753_v60, %v760_v61 }
 0x4db   : > { %v769_v63 = vsub.f32 %v757_v52, %v768_v62  ;;  %v1240_v52 = vpop.permute.xlu0 %1239 }
 0x4dc   : > { %v1241_v54 = vunpack.i.l.bf16 %v1240_v52  ;;  %v1242_v56 = vunpack.i.h.bf16 %v1240_v52 }
 0x4dd   : > { %v770_v0 = vmul.f32 %v769_v63, %v769_v63 }
 0x4de   : > { %918 = vmatpush.msra.mxu3 %v1241_v54 }
 0x4df   : > { %v771_v5 = vsel %vm311_vm0, %v770_v0, 0.0 }
 0x4e0   : > { %772 = vadd.xlane.f32.xlu1 %v771_v5  ;;  %919 = vmatpush.msra.mxu3 %v1242_v56 }
 0x553   : > { %v773_v13 = vpop.xlane.xlu1 %772 }
 0x554   : > { %v774_v14 = vmul.f32 %v773_v13, %v1753_v60 }
 0x556   : > { %v775_v17 = vadd.f32 1e-05, %v774_v14 }
 0x558   : > { %1261 = vrsqrt.f32 %v775_v17  ;;  %vm782_vm5 = vweird.f32 %v775_v17 }
 0x55e   : > { %v1262_v19 = vpop.eup %1261 }
 0x55f   : > { %v777_v20 = vmul.f32 %v1262_v19, %v775_v17  ;;  %vm783_vm1 = vweird.f32 %v1262_v19 }
 0x560   : > { %vm784_vm6 = vmor %vm782_vm5, %vm783_vm1 }
 0x561   : > { %v778_v22 = vmul.f32 %v1262_v19, %v777_v20 }
 0x563   : > { %v779_v23 = vmul.f32 0.5, %v778_v22 }
 0x565   : > { %v780_v25 = vsub.f32 1.5, %v779_v23 }
 0x567   : > { %v781_v26 = vmul.f32 %v1262_v19, %v780_v25 }
 0x569   : > { %v785_v28 = vsel %vm784_vm6, %v1262_v19, %v781_v26  ;;  %v867_v26 = vperm.slane %v1761_v24, 5 }
 0x56a   : > { %v786_v1 = vmul.f32 %v785_v28, %v769_v63 }
 0x56c   : > { %v788_v4 = vmul.f32 %v787_v6, %v786_v1 }
 0x56e   : > { %v1766_v29 = vadd.f32 %v789_v2, %v788_v4 }
 0x570   : > { %1109 = vmatmul.msk.f32.vlgmr.msrb.gmra.mxu2 %vm311_vm0, %v1766_v29 }
 0x5f3   : > { %v820_v35 = vpop.f32.mrf.mxu2 }
 0x5f4   : > { %v821_v37 = vadd.f32 %v820_v35, %v799_v33 }
 0x5f6   : > { %v824_v40 = vmul.f32 0.70710677, %v821_v37  ;;  %v823_v22 = vmul.f32 0.5, %v821_v37 }
 0x5f8   : > { %v825_v41 = vmul.f32 %v824_v40, %v824_v40 }
 0x5fa   : > { %v826_v42 = vmin.f32 %v825_v41, 16.0 }
 0x5fc   : > { %v827_v38 = vmul.f32 2.1237322e-06, %v826_v42  ;;  %v838_v45 = vmul.f32 3.8918573e-05, %v826_v42 }
 0x5fe   : > { %v828_v47 = vadd.f32 0.00028619796, %v827_v38  ;;  %v839_v48 = vadd.f32 0.001143296, %v838_v45 }
 0x600   : > { %v829_v49 = vmul.f32 %v828_v47, %v826_v42  ;;  %v840_v50 = vmul.f32 %v839_v48, %v826_v42 }
 0x602   : > { %v841_v51 = vadd.f32 0.014752088, %v840_v50  ;;  %v830_v53 = vadd.f32 0.0036580483, %v829_v49 }
 0x604   : > { %v842_v55 = vmul.f32 %v841_v51, %v826_v42  ;;  %v831_v58 = vmul.f32 %v830_v53, %v826_v42 }
 0x606   : > { %v843_v57 = vadd.f32 0.112945676, %v842_v55  ;;  %v832_v62 = vadd.f32 0.05243302, %v831_v58 }
 0x608   : > { %v844_v59 = vmul.f32 %v843_v57, %v826_v42  ;;  %v833_v5 = vmul.f32 %v832_v62, %v826_v42 }
 0x60a   : > { %v845_v61 = vadd.f32 0.4994258, %v844_v59  ;;  %v834_v3 = vadd.f32 0.18741608, %v833_v5 }
 0x60c   : > { %v846_v63 = vmul.f32 %v845_v61, %v826_v42  ;;  %v835_v8 = vmul.f32 %v834_v3, %v826_v42  ;;  %v947_v42 = vperm.slane %v1761_v24, 2 }
 0x60e   : > { %v847_v0 = vadd.f32 1.0, %v846_v63  ;;  %v836_v12 = vadd.f32 1.1283791, %v835_v8 }
 0x610   : > { %1263 = vrcp.f32 %v847_v0  ;;  %v859_v11 = vand.u32 2147483648, %v847_v0  ;;  %v857_v14 = vand.u32 2147483647, %v847_v0  ;;  %vm853_vm8 = vweird.f32 %v847_v0 }
 0x611   : > { %v837_v17 = vmul.f32 %v836_v12, %v824_v40 }
 0x612   : > { %v860_v16 = vor.u32 1.1754944e-38, %v859_v11  ;;  %vm858_vm10 = vcmp.eq.f32.partialorder %v857_v14, 8.507059e+37 }
 0x616   : > { %v1264_v7 = vpop.eup %1263 }
 0x617   : > { %v849_v9 = vmul.f32 %v1264_v7, %v847_v0  ;;  %vm854_vm7 = vweird.f32 %v1264_v7 }
 0x618   : > { %vm855_vm9 = vmor %vm853_vm8, %vm854_vm7 }
 0x619   : > { %v850_v10 = vsub.f32 1.0, %v849_v9 }
 0x61b   : > { %v851_v13 = vmul.f32 %v1264_v7, %v850_v10 }
 0x61d   : > { %v852_v15 = vadd.f32 %v1264_v7, %v851_v13 }
 0x61f   : > { %v856_v18 = vsel %vm855_vm9, %v1264_v7, %v852_v15 }
 0x620   : > { %v861_v19 = vsel %vm858_vm10, %v860_v16, %v856_v18 }
 0x621   : > { %v862_v20 = vmul.f32 %v861_v19, %v837_v17 }
 0x623   : > { %v1110_v21 = vclamps-f32 %v862_v20, 1.0 }
 0x625   : > { %v865_v23 = vadd.f32 1.0, %v1110_v21 }
 0x627   : > { %v866_v25 = vmul.f32 %v865_v23, %v823_v22 }
 0x629   : > { %1111 = vmatmul.msk.f32.vlgmr.msra.gmra.mxu3 %vm900_vm11, %v866_v25 }
 0x6ac   : > { %v921_v27 = vpop.f32.mrf.mxu3 }
 0x6ad   : > { %v922_v6 = vadd.f32 %v921_v27, %v867_v26 }
 0x6af   : > { %v924_v28 = vadd.f32 %v922_v6, %v1766_v29 }
 0x6b1   : > { %v925_v1 = vsel %vm311_vm0, %v924_v28, 0.0 }
 0x6b2   : > { %926 = vadd.xlane.f32.xlu0 %v925_v1 }
 0x725   : > { %v927_v2 = vpop.xlane.xlu0 %926 }
 0x726   : > { %v928_v4 = vmul.f32 %v927_v2, %v1753_v60 }
 0x728   : > { %v929_v30 = vsub.f32 %v924_v28, %v928_v4 }
 0x72a   : > { %v930_v31 = vmul.f32 %v929_v30, %v929_v30 }
 0x72c   : > { %v931_v32 = vsel %vm311_vm0, %v930_v31, 0.0 }
 0x72d   : > { %932 = vadd.xlane.f32.xlu2 %v931_v32 }
 0x7a0   : > { %v933_v33 = vpop.xlane.xlu2 %932 }
 0x7a1   : > { %v934_v34 = vmul.f32 %v933_v33, %v1753_v60 }
 0x7a3   : > { %v935_v35 = vadd.f32 1e-05, %v934_v34 }
 0x7a5   : > { %1265 = vrsqrt.f32 %v935_v35  ;;  %vm942_vm13 = vweird.f32 %v935_v35 }
 0x7ab   : > { %v1266_v36 = vpop.eup %1265 }
 0x7ac   : > { %v937_v29 = vmul.f32 %v1266_v36, %v935_v35  ;;  %vm943_vm12 = vweird.f32 %v1266_v36 }
 0x7ad   : > { %vm944_vm14 = vmor %vm942_vm13, %vm943_vm12 }
 0x7ae   : > { %v938_v37 = vmul.f32 %v1266_v36, %v937_v29 }
 0x7b0   : > { %v939_v39 = vmul.f32 0.5, %v938_v37 }
 0x7b2   : > { %v940_v40 = vsub.f32 1.5, %v939_v39 }
 0x7b4   : > { %v941_v41 = vmul.f32 %v1266_v36, %v940_v40 }
 0x7b6   : > { %v945_v60 = vsel %vm944_vm14, %v1266_v36, %v941_v41 }
 0x7b7   : > { %v946_v43 = vmul.f32 %v945_v60, %v929_v30 }
 0x7b9   : > { %v948_v38 = vmul.f32 %v947_v42, %v946_v43 }
 0x7bb   : > { %v950_v45 = vadd.f32 %v949_v44, %v948_v38 }
 0x7bd   : > { %951 = vst.msk [vmem:[%s303_s23] sm:$0xff] %vm311_vm0, %v950_v45 }
 0x7be   : > { %1444 = shalt.err (!%p1441_p9)
}
 0x7bf   : > { %1134 = dma.vmem_to_hbm [thread:$0]  (%p1629_p5), %s966_s24, 128, %s968_s27, %s953_s25  }
 0x7c0 PF: > { %s979_s10 = sand.u32 1, %s1479_s18   ;;  %p1828_p10 = scmp.ge.s32.totalorder %s1491_s21, 2 }
 0x7c1   : > { %s980_s9 = scalar_lea.sflag [#allocation4], %s979_s10 }
 0x7c2   : > { %p1154_p13 = pnand %p1828_p10, %p1633_p6 }
 0x7c4   : > { %p1155_p11 = pneg %p1154_p13 }
 0x7c6   : > { %1474 = dma.done.wait (%p1155_p11), %s980_s9, 128  }
 0x7c7   : > { %1476 = vsyncadd (%p1155_p11), %s980_s9, 4294967168  ;;  %p20_p0 = scmp.ge.s32.totalorder %s1603_s29, 4   ;;  %s1829_s18 = smov %s1483_s19 }
 0x7c8   : > { %s1830_s19 = smov %s1487_s20  ;;  %s1831_s20 = smov %s1614_s8 }
 0x7c9   : > { %s1832_s21 = smov %s1603_s29  ;;  %22 = sbr.rel (!%p20_p0) target bundleno = 7 (0x7), region = 101 }
 0x7ce   :  { %986 = vsyncpa [#allocation3], 1 }
 0x7cf   :  { %988 = vsyncpa [#allocation3 + $0x1], 1 }
 0x7d0   :  { %989 = vsyncpa [#allocation6], 1 }
 0x7d1   :  { %990 = vsyncpa [#allocation9], 1 }
 0x7d2   :  { %991 = vsyncpa [#allocation4], 1 }
 0x7d3   :  { %993 = vsyncpa [#allocation4 + $0x1], 1 }

</bundles_post_ra>
